<compile_context>
chip_gen: v6e
topology: v6e:2x2x1
jax: 0.10.0
libtpu: 0.0.40
codegen_flags: <defaults>
</compile_context>

<pallas_src>
import functools

import jax
import jax.numpy as jnp
from jax.experimental import pallas as pl
from jax.experimental.pallas import tpu as pltpu


# --------------------------- Pallas GEMM (hot path) --------------------------
def _gfb_gemm_kernel(w_ref, p_ref, o_ref):
    # W: (Cout, K) resident in VMEM; P: (1, K, tm) tile of one image;
    # O: (1, Cout, tm).  Full K is resident, so there is no reduction axis and
    # no accumulator: one MXU dot + one lane-dense store per grid point.
    o_ref[0] = jnp.dot(w_ref[...], p_ref[0],
                       preferred_element_type=jnp.float32).astype(o_ref.dtype)


def gfb_gemm(w, p, *, vmem_budget_bytes=16 * 1024 * 1024, tm_cap=1024):
    """(Cout, K) @ (N, K, M) -> (N, Cout, M) float32, tiled over (N, M)."""
    Cout, K = w.shape
    N, K2, M = p.shape
    assert K == K2

    # Largest lane tile that keeps the double-buffered P stream inside the
    # VMEM budget, rounded down to a multiple of 128 and capped at tm_cap.
    bytes_per_col = K * p.dtype.itemsize
    tm_budget = max(128, (vmem_budget_bytes // (2 * bytes_per_col)) // 128 * 128)
    tm_max = min(tm_cap, tm_budget)
    tm = M if M <= tm_max else tm_max          # full extent or 128-multiple
    grid = (N, pl.cdiv(M, tm))

    # Advisory cost hint so XLA schedules the surrounding im2col glue sensibly.
    cost = pl.CostEstimate(
        flops=2 * N * M * K * Cout,
        transcendentals=0,
        bytes_accessed=(w.size * w.dtype.itemsize
                        + p.size * p.dtype.itemsize
                        + N * Cout * M * 4))

    return pl.pallas_call(
        _gfb_gemm_kernel,
        out_shape=jax.ShapeDtypeStruct((N, Cout, M), jnp.float32),
        grid=grid,
        in_specs=[
            pl.BlockSpec((Cout, K), lambda n, j: (0, 0)),      # weight: VMEM-resident
            pl.BlockSpec((1, K, tm), lambda n, j: (n, 0, j)),  # patches: stream over (N, M)
        ],
        out_specs=pl.BlockSpec((1, Cout, tm), lambda n, j: (n, 0, j)),
        compiler_params=pltpu.CompilerParams(
            dimension_semantics=("parallel", "parallel"),       # megacore-shardable
            vmem_limit_bytes=32 * 1024 * 1024),                 # fits v7x 64 MiB w/ headroom
        cost_estimate=cost,
    )(w, p)


# --------------------------------- GFB forward -------------------------------
def gfb_forward(x, weight, stride, padding, *, compute_dtype=None):
    """F.conv2d(x, weight, bias=None, stride, padding) with NCHW / OIHW layouts."""
    N, Cin, H, W = x.shape
    Cout, Cin_w, KH, KW = weight.shape
    assert Cin == Cin_w
    SH, SW = stride
    PH, PW = padding
    Ho = (H + 2 * PH - KH) // SH + 1
    Wo = (W + 2 * PW - KW) // SW + 1
    K = Cin * KH * KW

    # Glue (pure data movement): zero-pad + im2col, built directly in the
    # (N, K, Ho*Wo) layout the kernel consumes — only contiguous flattens, no
    # transposes of the KH*KW-inflated patch tensor.
    # TODO(synk): for very large inputs, fold patch extraction into the Pallas
    # kernel (pl.ANY + per-(kh,kw) DMA) so the inflated patch tensor never
    # round-trips HBM.
    x_pad = jnp.pad(x, ((0, 0), (0, 0), (PH, PH), (PW, PW)))
    slices = []
    for kh in range(KH):
        for kw in range(KW):
            sl = jax.lax.slice(
                x_pad,
                (0, 0, kh, kw),
                (N, Cin, kh + SH * (Ho - 1) + 1, kw + SW * (Wo - 1) + 1),
                (1, 1, SH, SW))                    # (N, Cin, Ho, Wo)
            slices.append(sl)
    patches = jnp.stack(slices, axis=2)            # (N, Cin, KH*KW, Ho, Wo)
    p = patches.reshape(N, K, Ho * Wo)             # contiguous flatten -> GEMM RHS
    w = weight.reshape(Cout, K)                    # GEMM LHS (Cout, K)

    if compute_dtype is not None:                  # e.g. jnp.bfloat16 on v6e/v7x
        p = p.astype(compute_dtype)
        w = w.astype(compute_dtype)

    out = gfb_gemm(w, p)                           # (N, Cout, Ho*Wo) float32
    return out.reshape(N, Cout, Ho, Wo)            # free reshape, no transpose


if __name__ == "__main__":
    key = jax.random.PRNGKey(0)
    kx, kwt = jax.random.split(key)

    # Small shapes consistent with the module: stride=4, padding=ks//2.
    N, Cin, H, W = 2, 4, 16, 16
    Cout, KS, S = 8, 7, 4

    x = jax.random.normal(kx, (N, Cin, H, W), dtype=jnp.float32)
    # GFB.__init__ builds a zero (Cout, Cin, KS, KS) weight; use deterministic
    # random values so the output is non-trivial.
    # TODO(synk): gabor_kernel-based GFB.initialize() is not part of forward();
    # weights here are synthetic deterministic values, not Gabor filters.
    weight = jax.random.normal(kwt, (Cout, Cin, KS, KS), dtype=jnp.float32)

    fwd = jax.jit(functools.partial(
        gfb_forward, stride=(S, S), padding=(KS // 2, KS // 2)))
    out = jax.block_until_ready(fwd(x, weight))

    # Reference check against XLA's conv (same semantics as F.conv2d).
    ref = jax.lax.conv_general_dilated(
        x, weight, window_strides=(S, S),
        padding=[(KS // 2, KS // 2), (KS // 2, KS // 2)],
        dimension_numbers=("NCHW", "OIHW", "NCHW"))
    Ho = (H + 2 * (KS // 2) - KS) // S + 1
    assert out.shape == ref.shape == (N, Cout, Ho, Ho)
    assert jnp.allclose(out, ref, atol=1e-3, rtol=1e-3)
    print("KERNEL_OK")
</pallas_src>

<mosaic_0001>
module attributes {stable_mosaic.version = 11 : i64} {
  func.func @_gfb_gemm_kernel(%arg0: i32, %arg1: i32, %arg2: memref<8x196xf32, #tpu.memory_space<vmem>>, %arg3: memref<1x196x16xf32, #tpu.memory_space<vmem>>, %arg4: memref<1x8x16xf32, #tpu.memory_space<vmem>>) attributes {dimension_semantics = [#tpu.dimension_semantics<parallel>, #tpu.dimension_semantics<parallel>], iteration_bounds = array<i64: 2, 1>, scalar_prefetch = 0 : i64, scratch_operands = 0 : i64, tpu.core_type = #tpu.core_type<tc>, window_params = [{pipeline_mode = #tpu.pipeline_mode<synchronous>, transform_indices = @transform_0, window_bounds = array<i64: 8, 196>}, {transform_indices = @transform_1, window_bounds = array<i64: 1, 196, 16>}, {transform_indices = @transform_2, window_bounds = array<i64: 1, 8, 16>}]} {
    %c0 = arith.constant 0 : index
    %c0_0 = arith.constant 0 : index
    %0 = vector.load %arg2[%c0, %c0_0] : memref<8x196xf32, #tpu.memory_space<vmem>>, vector<8x196xf32>
    %c0_1 = arith.constant 0 : index
    %c0_2 = arith.constant 0 : index
    %c0_3 = arith.constant 0 : index
    %1 = vector.load %arg3[%c0_1, %c0_2, %c0_3] : memref<1x196x16xf32, #tpu.memory_space<vmem>>, vector<1x196x16xf32>
    %2 = vector.shape_cast %1 : vector<1x196x16xf32> to vector<196x16xf32>
    %cst = arith.constant dense<0.000000e+00> : vector<8x16xf32>
    %3 = tpu.matmul %0, %2, %cst {dimension_numbers = #tpu.dot_dimension_numbers<[1], [0], [0], [1], [0, 0, 1, 1], [], []>} : vector<8x196xf32>, vector<196x16xf32>, vector<8x16xf32> -> vector<8x16xf32>
    %c0_4 = arith.constant 0 : index
    %c0_5 = arith.constant 0 : index
    %c0_6 = arith.constant 0 : index
    %4 = vector.load %arg4[%c0_4, %c0_5, %c0_6] : memref<1x8x16xf32, #tpu.memory_space<vmem>>, vector<1x8x16xf32>
    %5 = vector.shape_cast %4 : vector<1x8x16xf32> to vector<8x16xf32>
    %6 = vector.shape_cast %3 : vector<8x16xf32> to vector<1x8x16xf32>
    tpu.vector_store %arg4[%c0_4, %c0_5, %c0_6], %6 {strides = array<i32>} : memref<1x8x16xf32, #tpu.memory_space<vmem>>, vector<1x8x16xf32>,
    return
  }
  func.func @transform_0(%arg0: i32, %arg1: i32) -> (i32, i32) {
    %c0_i32 = arith.constant 0 : i32
    %c0_i32_0 = arith.constant 0 : i32
    %c0_i32_1 = arith.constant 0 : i32
    return %c0_i32, %c0_i32_0 : i32, i32
  }
  func.func @transform_1(%arg0: i32, %arg1: i32) -> (i32, i32, i32) {
    %c0_i32 = arith.constant 0 : i32
    %c0_i32_0 = arith.constant 0 : i32
    return %arg0, %c0_i32, %arg1 : i32, i32, i32
  }
  func.func @transform_2(%arg0: i32, %arg1: i32) -> (i32, i32, i32) {
    %c0_i32 = arith.constant 0 : i32
    %c0_i32_0 = arith.constant 0 : i32
    return %arg0, %c0_i32, %arg1 : i32, i32, i32
  }
}

</mosaic_0001>

<bundles_post_ra>
// kernel: gfb_forward.1
= control target key start
LH: loop header
LB: loop body
LE: loop exit
PB: predicated region body
PF: predicated region fallthrough
CT: control target
= control target key end

     0   :  { %s434_s9 = smov 0   ;;  %s436_s10 = smov 0   ;;  %s529_s0 = inlined_call_operand.vmem [shape: f32[8,196], index: 0, kind: input, shape index: {}]   ;;  %s530_s1 = inlined_call_operand.vmem [shape: f32[2,196,16], index: 1, kind: input, shape index: {}]   ;;  %s531_s2 = inlined_call_operand.vmem [shape: f32[2,8,16], index: 2, kind: output, shape index: {}]  }
   0x1   :  { %s438_s11 = smov 0  }
   0x2 LB: > { %s24_s12 = sadd.s32 1, %s412_s10  ;;  %p361_p0 = scmp.ge.s32.totalorder %s416_s11, 1  ;;  %s416_s11 = sphi %s438_s11, %s12_s11   ;;  %s412_s10 = sphi %s436_s10, %s533_s10   ;;  %s408_s9 = sphi %s434_s9, %s532_s9  }
   0x3   : > { %p26_p1 = scmp.ge.s32.totalorder %s24_s12, 2  ;;  %p131_p2 = scmp.lt.s32.totalorder %s416_s11, 3 }
   0x5   : > { %s535_s12 = smov (%p26_p1, %s24_s12), 0  ;;  %p132_p3 = pnand %p361_p0, %p131_p2 }
   0x6   : > { %p158_p4 = scmp.lt.s32.totalorder (!%p132_p3), %s408_s9, 1 }
   0x7   : > { %135 = sbr.rel (%p132_p3) target bundleno = 261 (0x105), region = 28 }
   0xc   : > { %v174_v0 = vld [vmem:[%s529_s0 + $0x8] sm:$0xff]  ;;  %vm200_vm0 = vcmask 556032   ;;  %v418_v1 = vmov 0.0   ;;  %s537_s9 = smov (!%p158_p4, %s408_s9), 1  ;;  %vm204_vm1 = vcmask 1043456   ;;  %v173_v27 = vld [vmem:[%s529_s0] sm:$0xff] }
   0xd   : > { %208 = vmatprep.subr.mxu0 %v418_v1  ;;  %365 = vmatprep.mubr.msk.f32.mxu0 %vm200_vm0, %v174_v0  ;;  %s368_s15 = smul.u32 200, %s537_s9  ;;  %s363_s21 = sshll.u32 %s537_s9, 3  ;;  %vm278_vm2 = vcmask 130048  }
   0xe   : > { %s172_s24 = scalar_lea.vmem %s531_s2, %s363_s21 }
   0xf   : > { %s462_s18 = scalar_lea.vmem %s530_s1, %s368_s15 }
  0x10   : > { %v190_v2 = vld [vmem:[%s462_s18 + $0x78] sm:$0xff]  ;;  %v189_v3 = vld [vmem:[%s462_s18 + $0x70] sm:$0xff]  ;;  %v188_v4 = vld [vmem:[%s462_s18 + $0x68] sm:$0xff] }
  0x11   : > { %209 = vmatpush1.msra.mxu0 %v190_v2  ;;  %v187_v5 = vld [vmem:[%s462_s18 + $0x60] sm:$0xff]  ;;  %v186_v6 = vld [vmem:[%s462_s18 + $0x58] sm:$0xff]  ;;  %v185_v7 = vld [vmem:[%s462_s18 + $0x50] sm:$0xff] }
  0x12   : > { %210 = vmatprep.subr.mxu0 %v418_v1  ;;  %v184_v8 = vld [vmem:[%s462_s18 + $0x48] sm:$0xff]  ;;  %v183_v9 = vld [vmem:[%s462_s18 + $0x40] sm:$0xff]  ;;  %v182_v10 = vld [vmem:[%s462_s18 + $0x38] sm:$0xff] }
  0x13   : > { %211 = vmatpush1.msra.mxu0 %v189_v3  ;;  %v181_v11 = vld [vmem:[%s462_s18 + $0x30] sm:$0xff]  ;;  %v180_v12 = vld [vmem:[%s462_s18 + $0x28] sm:$0xff]  ;;  %v179_v13 = vld [vmem:[%s462_s18 + $0x20] sm:$0xff] }
  0x14   : > { %212 = vmatprep.subr.mxu0 %v418_v1  ;;  %v178_v14 = vld [vmem:[%s462_s18 + $0x18] sm:$0xff]  ;;  %v177_v15 = vld [vmem:[%s462_s18 + $0x10] sm:$0xff]  ;;  %v176_v16 = vld [vmem:[%s462_s18 + $0x8] sm:$0xff] }
  0x15   : > { %213 = vmatpush1.msra.mxu0 %v188_v4  ;;  %v175_v17 = vld [vmem:[%s462_s18] sm:$0xff]  ;;  %v198_v19 = vld [vmem:[%s462_s18 + $0xb8] sm:$0xff]  ;;  %v197_v20 = vld [vmem:[%s462_s18 + $0xb0] sm:$0xff] }
  0x16   : > { %214 = vmatprep.subr.mxu0 %v418_v1  ;;  %v199_v18 = vld [vmem:[%s462_s18 + $0xc0] sm:$0xf]  ;;  %v196_v21 = vld [vmem:[%s462_s18 + $0xa8] sm:$0xff]  ;;  %v194_v23 = vld [vmem:[%s462_s18 + $0x98] sm:$0xff] }
  0x17   : > { %215 = vmatpush1.msra.mxu0 %v187_v5  ;;  %v195_v22 = vld [vmem:[%s462_s18 + $0xa0] sm:$0xff]  ;;  %v193_v24 = vld [vmem:[%s462_s18 + $0x90] sm:$0xff]  ;;  %v192_v25 = vld [vmem:[%s462_s18 + $0x88] sm:$0xff] }
  0x18   : > { %216 = vmatprep.subr.mxu0 %v418_v1  ;;  %v191_v26 = vld [vmem:[%s462_s18 + $0x80] sm:$0xff] }
  0x19   : > { %217 = vmatpush1.msra.mxu0 %v186_v6 }
  0x1a   : > { %218 = vmatprep.subr.mxu0 %v418_v1 }
  0x1b   : > { %219 = vmatpush1.msra.mxu0 %v185_v7 }
  0x1c   : > { %220 = vmatprep.subr.mxu0 %v418_v1 }
  0x1d   : > { %221 = vmatpush1.msra.mxu0 %v184_v8 }
  0x1e   : > { %222 = vmatprep.subr.mxu0 %v418_v1 }
  0x1f   : > { %223 = vmatpush1.msra.mxu0 %v183_v9 }
  0x20   : > { %224 = vmatprep.subr.mxu0 %v418_v1 }
  0x21   : > { %225 = vmatpush1.msra.mxu0 %v182_v10 }
  0x22   : > { %226 = vmatprep.subr.mxu0 %v418_v1 }
  0x23   : > { %227 = vmatpush1.msra.mxu0 %v181_v11 }
  0x24   : > { %228 = vmatprep.subr.mxu0 %v418_v1 }
  0x25   : > { %229 = vmatpush1.msra.mxu0 %v180_v12 }
  0x26   : > { %230 = vmatprep.subr.mxu0 %v418_v1 }
  0x27   : > { %231 = vmatpush1.msra.mxu0 %v179_v13 }
  0x28   : > { %232 = vmatprep.subr.mxu0 %v418_v1 }
  0x29   : > { %233 = vmatpush1.msra.mxu0 %v178_v14 }
  0x2a   : > { %234 = vmatprep.subr.mxu0 %v418_v1 }
  0x2b   : > { %235 = vmatpush1.msra.mxu0 %v177_v15 }
  0x2c   : > { %236 = vmatprep.subr.mxu0 %v418_v1 }
  0x2d   : > { %237 = vmatpush1.msra.mxu0 %v176_v16 }
  0x2e   : > { %238 = vmatprep.subr.mxu0 %v418_v1 }
  0x2f   : > { %239 = vmatpush1.msra.mxu0 %v175_v17 }
  0x30   : > { %254 = vmatprep.subr.mxu0 %v418_v1 }
  0x31   : > { %364 = vmatpush2.msk.msra.mxu0 %vm204_vm1, %v199_v18 }
  0x32   : > { %256 = vmatprep.subr.mxu0 %v418_v1 }
  0x33   : > { %257 = vmatpush2.msra.mxu0 %v198_v19 }
  0x34   : > { %258 = vmatprep.subr.mxu0 %v418_v1 }
  0x35   : > { %259 = vmatpush2.msra.mxu0 %v197_v20 }
  0x36   : > { %260 = vmatprep.subr.mxu0 %v418_v1 }
  0x37   : > { %261 = vmatpush2.msra.mxu0 %v196_v21 }
  0x38   : > { %262 = vmatprep.subr.mxu0 %v418_v1 }
  0x39   : > { %263 = vmatpush2.msra.mxu0 %v195_v22 }
  0x3a   : > { %264 = vmatprep.subr.mxu0 %v418_v1 }
  0x3b   : > { %265 = vmatpush2.msra.mxu0 %v194_v23 }
  0x3c   : > { %266 = vmatprep.subr.mxu0 %v418_v1 }
  0x3d   : > { %267 = vmatpush2.msra.mxu0 %v193_v24 }
  0x3e   : > { %268 = vmatprep.subr.mxu0 %v418_v1 }
  0x3f   : > { %269 = vmatpush2.msra.mxu0 %v192_v25 }
  0x40   : > { %270 = vmatprep.subr.mxu0 %v418_v1 }
  0x41   : > { %271 = vmatpush2.msra.mxu0 %v191_v26 }
  0x42   : > { %273 = vmatmul.mubr.f32.vlgmr.msra.gmra.mxu0 %v173_v27 }
 0x102   : > { %v274_v28 = vpop.f32.mrf.mxu0 }
 0x103   : > { %279 = vst.msk [vmem:[%s172_s24] sm:$0xff] %vm278_vm2, %v274_v28 }
 0x104   : > { %v276_v29 = vpop.f32.mrf.mxu0 }
 0x105 PF: > { %s12_s11 = sadd.s32 1, %s416_s11   ;;  %s532_s9 = smov %s412_s10 }
 0x106   : > { %p9_p5 = scmp.ge.s32.totalorder %s12_s11, 4   ;;  %s533_s10 = smov %s535_s12 }
 0x108   :  { %11 = sbr.rel (!%p9_p5) target bundleno = 2 (0x2), region = 58 }

</bundles_post_ra>
